<compile_context>
chip_gen: v5e
topology: v5e:2x2
jax: 0.10.0
libtpu: 0.0.40
codegen_flags: <defaults>
</compile_context>

<pallas_src>
import functools

import numpy as np
import jax
import jax.numpy as jnp
from jax import lax
from jax.experimental import pallas as pl
from jax.experimental.pallas import tpu as pltpu


# ----------------------------------------------------------------------------
# Fused kernel: 3 x (conv1d valid + MaxPool1d(P) + LeakyReLU), channels-first
# ----------------------------------------------------------------------------
def _stage(x, w_flat, bias, K, P, neg_slope, xs_ref):
    """One conv1d(valid, stride 1) + MaxPool1d(P) + LeakyReLU stage.

    x:      (Cin, Lin)      activation value (channels on sublanes, time on lanes)
    w_flat: (Cout, K*Cin)   weights in im2col layout: w_flat[co, k*Cin + ci] = w[co, ci, k]
    bias:   (Cout, 1) or None
    xs_ref: VMEM scratch (K*Cin, Lconv) used as the im2col buffer
    """
    Cin, Lin = x.shape
    Lconv = Lin - K + 1
    Lpool = Lconv // P

    # im2col: xs[k*Cin + ci, j] = x[ci, j + k]
    # (lane shifts land on the XLU; stores are aligned VMEM writes)
    for k in range(K):
        xs_ref[k * Cin:(k + 1) * Cin, :] = x[:, k:k + Lconv]
    xs = xs_ref[...]                                              # (K*Cin, Lconv)

    # Single MXU matmul per stage (contraction dim K*Cin).
    y = jnp.dot(w_flat, xs, preferred_element_type=jnp.float32)   # (Cout, Lconv)
    if bias is not None:
        y = y + bias                                              # (Cout, 1) lane-broadcast

    # MaxPool1d(P) (stride P, floor): for each phase p pick y[:, j*P + p] via an exact
    # 0/1 selection matmul, then combine phases with jnp.maximum on the VPU.
    l_idx = lax.broadcasted_iota(jnp.int32, (Lconv, Lpool), 0)
    j_idx = lax.broadcasted_iota(jnp.int32, (Lconv, Lpool), 1)
    pooled = None
    for p in range(P):
        sel = (l_idx == j_idx * P + p).astype(jnp.float32)        # (Lconv, Lpool)
        z = jnp.dot(y, sel, preferred_element_type=jnp.float32)   # (Cout, Lpool)
        pooled = z if pooled is None else jnp.maximum(pooled, z)

    # LeakyReLU(neg_slope)
    return jnp.where(pooled >= 0, pooled, neg_slope * pooled)


def _encoder_kernel(x_ref, w1_ref, w2_ref, b2_ref, w3_ref, b3_ref, o_ref,
                    xs1_ref, xs2_ref, xs3_ref, *, K, P, neg_slope):
    # x_ref block: (1, 1, T)  ->  (Cin=1, T), channels-first, time on lanes.
    x = x_ref[0]
    h = _stage(x, w1_ref[...], None,        K[0], P[0], neg_slope, xs1_ref)   # SincConv (no bias)
    h = _stage(h, w2_ref[...], b2_ref[...], K[1], P[1], neg_slope, xs2_ref)   # conv1d2
    h = _stage(h, w3_ref[...], b3_ref[...], K[2], P[2], neg_slope, xs3_ref)   # conv1d3
    o_ref[0] = h                                                              # (C3, L3)


def encoder_forward(inputs_ncl, params, cnn_len_filt, cnn_max_pool_len, neg_slope=0.2):
    """inputs_ncl: (B, 1, T) float32, same NCL layout as the PyTorch module."""
    B, cin0, T = inputs_ncl.shape
    assert cin0 == 1
    w1, w2, b2, w3, b3 = (params["w1"], params["w2"], params["b2"],
                          params["w3"], params["b3"])
    C1, C2, C3 = w1.shape[0], w2.shape[0], w3.shape[0]
    K1, K2, K3 = cnn_len_filt
    P1, P2, P3 = cnn_max_pool_len
    L1c = T - K1 + 1
    L1 = L1c // P1
    L2c = L1 - K2 + 1
    L2 = L2c // P2
    L3c = L2 - K3 + 1
    L3 = L3c // P3

    kernel = functools.partial(_encoder_kernel, K=(K1, K2, K3), P=(P1, P2, P3),
                               neg_slope=neg_slope)

    out = pl.pallas_call(
        kernel,
        out_shape=jax.ShapeDtypeStruct((B, C3, L3), jnp.float32),
        grid_spec=pltpu.PrefetchScalarGridSpec(
            num_scalar_prefetch=0,
            grid=(B,),
            in_specs=[
                pl.BlockSpec((1, 1, T), lambda b: (b, 0, 0)),       # waveform, NCL
                pl.BlockSpec((C1, K1), lambda b: (0, 0)),           # sinc filters (im2col)
                pl.BlockSpec((C2, K2 * C1), lambda b: (0, 0)),      # conv1d2 weights (im2col)
                pl.BlockSpec((C2, 1), lambda b: (0, 0)),            # conv1d2 bias
                pl.BlockSpec((C3, K3 * C2), lambda b: (0, 0)),      # conv1d3 weights (im2col)
                pl.BlockSpec((C3, 1), lambda b: (0, 0)),            # conv1d3 bias
            ],
            out_specs=pl.BlockSpec((1, C3, L3), lambda b: (b, 0, 0)),
            scratch_shapes=[
                pltpu.VMEM((K1 * 1, L1c), jnp.float32),             # im2col buffers
                pltpu.VMEM((K2 * C1, L2c), jnp.float32),
                pltpu.VMEM((K3 * C2, L3c), jnp.float32),
            ],
        ),
        compiler_params=pltpu.CompilerParams(
            dimension_semantics=("parallel",)),
    )(inputs_ncl, w1, w2, b2, w3, b3)

    # nn.Flatten() on (B, C, L) -> (B, C*L); done on the HBM output (layout-only op).
    return out.reshape(B, C3 * L3)


# ----------------------------------------------------------------------------
# SincConv parameter / filter construction (deterministic, plain numpy glue)
# ----------------------------------------------------------------------------
def make_sinc_params(n_filt, fs):
    low_freq_mel = 80.0
    high_freq_mel = 2595.0 * np.log10(1.0 + (fs / 2.0) / 700.0)
    mel_points = np.linspace(low_freq_mel, high_freq_mel, n_filt)
    f_cos = 700.0 * (10.0 ** (mel_points / 2595.0) - 1.0)
    b1 = np.roll(f_cos, 1)
    b2 = np.roll(f_cos, -1)
    b1[0] = 30.0
    b2[-1] = (fs / 2.0) - 100.0
    filt_b1 = b1 / fs
    filt_band = (b2 - b1) / fs
    return filt_b1, filt_band


def build_sinc_filters(filt_b1, filt_band, filt_dim, fs):
    N = filt_dim
    n_filt = filt_b1.shape[0]
    t_right = np.linspace(1.0, (N - 1) / 2.0, int((N - 1) / 2)) / fs

    min_freq, min_band = 50.0, 50.0
    beg = np.abs(filt_b1) + min_freq / fs
    end = beg + (np.abs(filt_band) + min_band / fs)

    n = np.linspace(0.0, N, N)
    window = 0.54 - 0.46 * np.cos(2.0 * np.pi * n / N)

    def sinc_bank(band_hz):
        arg = 2.0 * np.pi * band_hz[:, None] * t_right[None, :]
        y_right = np.sin(arg) / arg
        y_left = y_right[:, ::-1]
        ones = np.ones((n_filt, 1))
        return np.concatenate([y_left, ones, y_right], axis=1)

    low_pass1 = 2.0 * beg[:, None] * sinc_bank(beg * fs)
    low_pass2 = 2.0 * end[:, None] * sinc_bank(end * fs)
    band_pass = low_pass2 - low_pass1
    band_pass = band_pass / np.max(band_pass, axis=1, keepdims=True)
    filters = band_pass * window[None, :]
    return jnp.asarray(filters, jnp.float32)          # (N_filt, Filt_dim)


# ----------------------------------------------------------------------------
# Parameter init (im2col weight layout: w_flat[co, k*Cin + ci] = w[co, ci, k])
# ----------------------------------------------------------------------------
def init_params(key, cnn_N_filt, cnn_len_filt, fs):
    filt_b1, filt_band = make_sinc_params(cnn_N_filt[0], fs)
    w1 = build_sinc_filters(filt_b1, filt_band, cnn_len_filt[0], fs)   # (C1, K1), Cin=1

    def conv_init(k, cin, cout, ksz):
        kw, kb = jax.random.split(k)
        bound = 1.0 / np.sqrt(cin * ksz)
        w = jax.random.uniform(kw, (cout, cin, ksz), jnp.float32, -bound, bound)
        b = jax.random.uniform(kb, (cout,), jnp.float32, -bound, bound)
        w_flat = jnp.transpose(w, (0, 2, 1)).reshape(cout, ksz * cin)
        return w_flat, b.reshape(cout, 1)

    k2, k3 = jax.random.split(key)
    w2, b2 = conv_init(k2, cnn_N_filt[0], cnn_N_filt[1], cnn_len_filt[1])
    w3, b3 = conv_init(k3, cnn_N_filt[1], cnn_N_filt[2], cnn_len_filt[2])
    return {"w1": w1, "w2": w2, "b2": b2, "w3": w3, "b3": b3}


# ----------------------------------------------------------------------------
# Pure-JAX reference (mirrors the PyTorch forward) for a correctness check
# ----------------------------------------------------------------------------
def _reference_forward(x_ncl, params, cnn_len_filt, cnn_max_pool_len, neg_slope=0.2):
    def unflatten(w_flat, cin, ksz):
        cout = w_flat.shape[0]
        return w_flat.reshape(cout, ksz, cin).transpose(0, 2, 1)    # (Cout, Cin, K)

    def stage(x, w, b, P):
        y = lax.conv_general_dilated(x, w, (1,), "VALID",
                                     dimension_numbers=("NCH", "OIH", "NCH"))
        if b is not None:
            y = y + b.reshape(1, -1, 1)
        Bn, Cn, Ln = y.shape
        Lp = Ln // P
        y = y[:, :, :Lp * P].reshape(Bn, Cn, Lp, P).max(axis=-1)
        return jnp.where(y >= 0, y, neg_slope * y)

    K1, K2, K3 = cnn_len_filt
    C1 = params["w1"].shape[0]
    C2 = params["w2"].shape[0]
    w1 = unflatten(params["w1"], 1, K1)
    w2 = unflatten(params["w2"], C1, K2)
    w3 = unflatten(params["w3"], C2, K3)
    x = stage(x_ncl, w1, None, cnn_max_pool_len[0])
    x = stage(x, w2, params["b2"], cnn_max_pool_len[1])
    x = stage(x, w3, params["b3"], cnn_max_pool_len[2])
    return x.reshape(x.shape[0], -1)


if __name__ == "__main__":
    # Small, consistent configuration (same as the PyTorch module at toy scale).
    B, T = 2, 200
    cnn_N_filt = [8, 16, 16]
    cnn_len_filt = [17, 5, 5]
    cnn_max_pool_len = [2, 2, 2]
    sampling_rate = 16000

    key = jax.random.PRNGKey(0)
    k_in, k_par = jax.random.split(key)
    inputs = jax.random.normal(k_in, (B, 1, T), jnp.float32)   # NCL, like PyTorch

    params = init_params(k_par, cnn_N_filt, cnn_len_filt, sampling_rate)

    out = encoder_forward(inputs, params, cnn_len_filt, cnn_max_pool_len)
    out = jax.block_until_ready(out)

    # Expected flattened size: 16 channels * 20 time steps = 320
    assert out.shape == (B, cnn_N_filt[2] * 20), out.shape

    ref = _reference_forward(inputs, params, cnn_len_filt, cnn_max_pool_len)
    np.testing.assert_allclose(np.asarray(out), np.asarray(ref), rtol=2e-3, atol=2e-3)

    print("KERNEL_OK")
</pallas_src>

<mosaic_0001>
module attributes {stable_mosaic.version = 11 : i64} {
  func.func @_encoder_kernel(%arg0: i32, %arg1: memref<1x1x200xf32, #tpu.memory_space<vmem>>, %arg2: memref<8x17xf32, #tpu.memory_space<vmem>>, %arg3: memref<16x40xf32, #tpu.memory_space<vmem>>, %arg4: memref<16x1xf32, #tpu.memory_space<vmem>>, %arg5: memref<16x80xf32, #tpu.memory_space<vmem>>, %arg6: memref<16x1xf32, #tpu.memory_space<vmem>>, %arg7: memref<1x16x20xf32, #tpu.memory_space<vmem>>, %arg8: memref<17x184xf32, #tpu.memory_space<vmem>>, %arg9: memref<40x88xf32, #tpu.memory_space<vmem>>, %arg10: memref<80x40xf32, #tpu.memory_space<vmem>>) attributes {dimension_semantics = [#tpu.dimension_semantics<parallel>], iteration_bounds = array<i64: 2>, scalar_prefetch = 0 : i64, scratch_operands = 3 : i64, tpu.core_type = #tpu.core_type<tc>, window_params = [{transform_indices = @transform_0, window_bounds = array<i64: 1, 1, 200>}, {pipeline_mode = #tpu.pipeline_mode<synchronous>, transform_indices = @transform_1, window_bounds = array<i64: 8, 17>}, {pipeline_mode = #tpu.pipeline_mode<synchronous>, transform_indices = @transform_2, window_bounds = array<i64: 16, 40>}, {pipeline_mode = #tpu.pipeline_mode<synchronous>, transform_indices = @transform_3, window_bounds = array<i64: 16, 1>}, {pipeline_mode = #tpu.pipeline_mode<synchronous>, transform_indices = @transform_4, window_bounds = array<i64: 16, 80>}, {pipeline_mode = #tpu.pipeline_mode<synchronous>, transform_indices = @transform_5, window_bounds = array<i64: 16, 1>}, {transform_indices = @transform_6, window_bounds = array<i64: 1, 16, 20>}]} {
    %c0 = arith.constant 0 : index
    %c0_0 = arith.constant 0 : index
    %c0_1 = arith.constant 0 : index
    %0 = vector.load %arg1[%c0, %c0_0, %c0_1] : memref<1x1x200xf32, #tpu.memory_space<vmem>>, vector<1x1x200xf32>
    %1 = vector.shape_cast %0 : vector<1x1x200xf32> to vector<1x200xf32>
    %c0_2 = arith.constant 0 : index
    %c0_3 = arith.constant 0 : index
    %2 = vector.load %arg2[%c0_2, %c0_3] : memref<8x17xf32, #tpu.memory_space<vmem>>, vector<8x17xf32>
    %3 = vector.extract_strided_slice %1 {offsets = [0, 0], sizes = [1, 184], strides = [1, 1]} : vector<1x200xf32> to vector<1x184xf32>
    %c0_4 = arith.constant 0 : index
    %c0_5 = arith.constant 0 : index
    %4 = vector.load %arg8[%c0_4, %c0_5] : memref<17x184xf32, #tpu.memory_space<vmem>>, vector<1x184xf32>
    tpu.vector_store %arg8[%c0_4, %c0_5], %3 {strides = array<i32>} : memref<17x184xf32, #tpu.memory_space<vmem>>, vector<1x184xf32>,
    %5 = vector.extract_strided_slice %1 {offsets = [0, 1], sizes = [1, 184], strides = [1, 1]} : vector<1x200xf32> to vector<1x184xf32>
    %c1 = arith.constant 1 : index
    %c0_6 = arith.constant 0 : index
    %6 = vector.load %arg8[%c1, %c0_6] : memref<17x184xf32, #tpu.memory_space<vmem>>, vector<1x184xf32>
    tpu.vector_store %arg8[%c1, %c0_6], %5 {strides = array<i32>} : memref<17x184xf32, #tpu.memory_space<vmem>>, vector<1x184xf32>,
    %7 = vector.extract_strided_slice %1 {offsets = [0, 2], sizes = [1, 184], strides = [1, 1]} : vector<1x200xf32> to vector<1x184xf32>
    %c2 = arith.constant 2 : index
    %c0_7 = arith.constant 0 : index
    %8 = vector.load %arg8[%c2, %c0_7] : memref<17x184xf32, #tpu.memory_space<vmem>>, vector<1x184xf32>
    tpu.vector_store %arg8[%c2, %c0_7], %7 {strides = array<i32>} : memref<17x184xf32, #tpu.memory_space<vmem>>, vector<1x184xf32>,
    %9 = vector.extract_strided_slice %1 {offsets = [0, 3], sizes = [1, 184], strides = [1, 1]} : vector<1x200xf32> to vector<1x184xf32>
    %c3 = arith.constant 3 : index
    %c0_8 = arith.constant 0 : index
    %10 = vector.load %arg8[%c3, %c0_8] : memref<17x184xf32, #tpu.memory_space<vmem>>, vector<1x184xf32>
    tpu.vector_store %arg8[%c3, %c0_8], %9 {strides = array<i32>} : memref<17x184xf32, #tpu.memory_space<vmem>>, vector<1x184xf32>,
    %11 = vector.extract_strided_slice %1 {offsets = [0, 4], sizes = [1, 184], strides = [1, 1]} : vector<1x200xf32> to vector<1x184xf32>
    %c4 = arith.constant 4 : index
    %c0_9 = arith.constant 0 : index
    %12 = vector.load %arg8[%c4, %c0_9] : memref<17x184xf32, #tpu.memory_space<vmem>>, vector<1x184xf32>
    tpu.vector_store %arg8[%c4, %c0_9], %11 {strides = array<i32>} : memref<17x184xf32, #tpu.memory_space<vmem>>, vector<1x184xf32>,
    %13 = vector.extract_strided_slice %1 {offsets = [0, 5], sizes = [1, 184], strides = [1, 1]} : vector<1x200xf32> to vector<1x184xf32>
    %c5 = arith.constant 5 : index
    %c0_10 = arith.constant 0 : index
    %14 = vector.load %arg8[%c5, %c0_10] : memref<17x184xf32, #tpu.memory_space<vmem>>, vector<1x184xf32>
    tpu.vector_store %arg8[%c5, %c0_10], %13 {strides = array<i32>} : memref<17x184xf32, #tpu.memory_space<vmem>>, vector<1x184xf32>,
    %15 = vector.extract_strided_slice %1 {offsets = [0, 6], sizes = [1, 184], strides = [1, 1]} : vector<1x200xf32> to vector<1x184xf32>
    %c6 = arith.constant 6 : index
    %c0_11 = arith.constant 0 : index
    %16 = vector.load %arg8[%c6, %c0_11] : memref<17x184xf32, #tpu.memory_space<vmem>>, vector<1x184xf32>
    tpu.vector_store %arg8[%c6, %c0_11], %15 {strides = array<i32>} : memref<17x184xf32, #tpu.memory_space<vmem>>, vector<1x184xf32>,
    %17 = vector.extract_strided_slice %1 {offsets = [0, 7], sizes = [1, 184], strides = [1, 1]} : vector<1x200xf32> to vector<1x184xf32>
    %c7 = arith.constant 7 : index
    %c0_12 = arith.constant 0 : index
    %18 = vector.load %arg8[%c7, %c0_12] : memref<17x184xf32, #tpu.memory_space<vmem>>, vector<1x184xf32>
    tpu.vector_store %arg8[%c7, %c0_12], %17 {strides = array<i32>} : memref<17x184xf32, #tpu.memory_space<vmem>>, vector<1x184xf32>,
    %19 = vector.extract_strided_slice %1 {offsets = [0, 8], sizes = [1, 184], strides = [1, 1]} : vector<1x200xf32> to vector<1x184xf32>
    %c8 = arith.constant 8 : index
    %c0_13 = arith.constant 0 : index
    %20 = vector.load %arg8[%c8, %c0_13] : memref<17x184xf32, #tpu.memory_space<vmem>>, vector<1x184xf32>
    tpu.vector_store %arg8[%c8, %c0_13], %19 {strides = array<i32>} : memref<17x184xf32, #tpu.memory_space<vmem>>, vector<1x184xf32>,
    %21 = vector.extract_strided_slice %1 {offsets = [0, 9], sizes = [1, 184], strides = [1, 1]} : vector<1x200xf32> to vector<1x184xf32>
    %c9 = arith.constant 9 : index
    %c0_14 = arith.constant 0 : index
    %22 = vector.load %arg8[%c9, %c0_14] : memref<17x184xf32, #tpu.memory_space<vmem>>, vector<1x184xf32>
    tpu.vector_store %arg8[%c9, %c0_14], %21 {strides = array<i32>} : memref<17x184xf32, #tpu.memory_space<vmem>>, vector<1x184xf32>,
    %23 = vector.extract_strided_slice %1 {offsets = [0, 10], sizes = [1, 184], strides = [1, 1]} : vector<1x200xf32> to vector<1x184xf32>
    %c10 = arith.constant 10 : index
    %c0_15 = arith.constant 0 : index
    %24 = vector.load %arg8[%c10, %c0_15] : memref<17x184xf32, #tpu.memory_space<vmem>>, vector<1x184xf32>
    tpu.vector_store %arg8[%c10, %c0_15], %23 {strides = array<i32>} : memref<17x184xf32, #tpu.memory_space<vmem>>, vector<1x184xf32>,
    %25 = vector.extract_strided_slice %1 {offsets = [0, 11], sizes = [1, 184], strides = [1, 1]} : vector<1x200xf32> to vector<1x184xf32>
    %c11 = arith.constant 11 : index
    %c0_16 = arith.constant 0 : index
    %26 = vector.load %arg8[%c11, %c0_16] : memref<17x184xf32, #tpu.memory_space<vmem>>, vector<1x184xf32>
    tpu.vector_store %arg8[%c11, %c0_16], %25 {strides = array<i32>} : memref<17x184xf32, #tpu.memory_space<vmem>>, vector<1x184xf32>,
    %27 = vector.extract_strided_slice %1 {offsets = [0, 12], sizes = [1, 184], strides = [1, 1]} : vector<1x200xf32> to vector<1x184xf32>
    %c12 = arith.constant 12 : index
    %c0_17 = arith.constant 0 : index
    %28 = vector.load %arg8[%c12, %c0_17] : memref<17x184xf32, #tpu.memory_space<vmem>>, vector<1x184xf32>
    tpu.vector_store %arg8[%c12, %c0_17], %27 {strides = array<i32>} : memref<17x184xf32, #tpu.memory_space<vmem>>, vector<1x184xf32>,
    %29 = vector.extract_strided_slice %1 {offsets = [0, 13], sizes = [1, 184], strides = [1, 1]} : vector<1x200xf32> to vector<1x184xf32>
    %c13 = arith.constant 13 : index
    %c0_18 = arith.constant 0 : index
    %30 = vector.load %arg8[%c13, %c0_18] : memref<17x184xf32, #tpu.memory_space<vmem>>, vector<1x184xf32>
    tpu.vector_store %arg8[%c13, %c0_18], %29 {strides = array<i32>} : memref<17x184xf32, #tpu.memory_space<vmem>>, vector<1x184xf32>,
    %31 = vector.extract_strided_slice %1 {offsets = [0, 14], sizes = [1, 184], strides = [1, 1]} : vector<1x200xf32> to vector<1x184xf32>
    %c14 = arith.constant 14 : index
    %c0_19 = arith.constant 0 : index
    %32 = vector.load %arg8[%c14, %c0_19] : memref<17x184xf32, #tpu.memory_space<vmem>>, vector<1x184xf32>
    tpu.vector_store %arg8[%c14, %c0_19], %31 {strides = array<i32>} : memref<17x184xf32, #tpu.memory_space<vmem>>, vector<1x184xf32>,
    %33 = vector.extract_strided_slice %1 {offsets = [0, 15], sizes = [1, 184], strides = [1, 1]} : vector<1x200xf32> to vector<1x184xf32>
    %c15 = arith.constant 15 : index
    %c0_20 = arith.constant 0 : index
    %34 = vector.load %arg8[%c15, %c0_20] : memref<17x184xf32, #tpu.memory_space<vmem>>, vector<1x184xf32>
    tpu.vector_store %arg8[%c15, %c0_20], %33 {strides = array<i32>} : memref<17x184xf32, #tpu.memory_space<vmem>>, vector<1x184xf32>,
    %35 = vector.extract_strided_slice %1 {offsets = [0, 16], sizes = [1, 184], strides = [1, 1]} : vector<1x200xf32> to vector<1x184xf32>
    %c16 = arith.constant 16 : index
    %c0_21 = arith.constant 0 : index
    %36 = vector.load %arg8[%c16, %c0_21] : memref<17x184xf32, #tpu.memory_space<vmem>>, vector<1x184xf32>
    tpu.vector_store %arg8[%c16, %c0_21], %35 {strides = array<i32>} : memref<17x184xf32, #tpu.memory_space<vmem>>, vector<1x184xf32>,
    %c0_22 = arith.constant 0 : index
    %c0_23 = arith.constant 0 : index
    %37 = vector.load %arg8[%c0_22, %c0_23] : memref<17x184xf32, #tpu.memory_space<vmem>>, vector<17x184xf32>
    %cst = arith.constant dense<0.000000e+00> : vector<8x184xf32>
    %38 = tpu.matmul %2, %37, %cst {dimension_numbers = #tpu.dot_dimension_numbers<[1], [0], [0], [1], [0, 0, 1, 1], [], []>} : vector<8x17xf32>, vector<17x184xf32>, vector<8x184xf32> -> vector<8x184xf32>
    %39 = tpu.iota {dimensions = array<i32: 0>} : vector<184x92xi32>
    %40 = tpu.iota {dimensions = array<i32: 1>} : vector<184x92xi32>
    %c2_i32 = arith.constant 2 : i32
    %41 = vector.broadcast %c2_i32 : i32 to vector<184x92xi32>
    %42 = arith.muli %40, %41 : vector<184x92xi32>
    %c0_i32 = arith.constant 0 : i32
    %43 = vector.broadcast %c0_i32 : i32 to vector<184x92xi32>
    %44 = arith.addi %42, %43 : vector<184x92xi32>
    %45 = arith.cmpi eq, %39, %44 : vector<184x92xi32>
    %46 = arith.extui %45 : vector<184x92xi1> to vector<184x92xi32>
    %47 = arith.sitofp %46 : vector<184x92xi32> to vector<184x92xf32>
    %cst_24 = arith.constant dense<0.000000e+00> : vector<8x92xf32>
    %48 = tpu.matmul %38, %47, %cst_24 {dimension_numbers = #tpu.dot_dimension_numbers<[1], [0], [0], [1], [0, 0, 1, 1], [], []>} : vector<8x184xf32>, vector<184x92xf32>, vector<8x92xf32> -> vector<8x92xf32>
    %c2_i32_25 = arith.constant 2 : i32
    %49 = vector.broadcast %c2_i32_25 : i32 to vector<184x92xi32>
    %50 = arith.muli %40, %49 : vector<184x92xi32>
    %c1_i32 = arith.constant 1 : i32
    %51 = vector.broadcast %c1_i32 : i32 to vector<184x92xi32>
    %52 = arith.addi %50, %51 : vector<184x92xi32>
    %53 = arith.cmpi eq, %39, %52 : vector<184x92xi32>
    %54 = arith.extui %53 : vector<184x92xi1> to vector<184x92xi32>
    %55 = arith.sitofp %54 : vector<184x92xi32> to vector<184x92xf32>
    %cst_26 = arith.constant dense<0.000000e+00> : vector<8x92xf32>
    %56 = tpu.matmul %38, %55, %cst_26 {dimension_numbers = #tpu.dot_dimension_numbers<[1], [0], [0], [1], [0, 0, 1, 1], [], []>} : vector<8x184xf32>, vector<184x92xf32>, vector<8x92xf32> -> vector<8x92xf32>
    %57 = arith.maximumf %48, %56 : vector<8x92xf32>
    %cst_27 = arith.constant 0.000000e+00 : f32
    %58 = vector.broadcast %cst_27 : f32 to vector<8x92xf32>
    %59 = arith.cmpf oge, %57, %58 : vector<8x92xf32>
    %cst_28 = arith.constant 2.000000e-01 : f32
    %60 = vector.broadcast %cst_28 : f32 to vector<8x92xf32>
    %61 = arith.mulf %60, %57 : vector<8x92xf32>
    %62 = arith.select %59, %57, %61 : vector<8x92xi1>, vector<8x92xf32>
    %c0_29 = arith.constant 0 : index
    %c0_30 = arith.constant 0 : index
    %63 = vector.load %arg3[%c0_29, %c0_30] : memref<16x40xf32, #tpu.memory_space<vmem>>, vector<16x40xf32>
    %c0_31 = arith.constant 0 : index
    %c0_32 = arith.constant 0 : index
    %64 = vector.load %arg4[%c0_31, %c0_32] : memref<16x1xf32, #tpu.memory_space<vmem>>, vector<16x1xf32>
    %65 = vector.extract_strided_slice %62 {offsets = [0, 0], sizes = [8, 88], strides = [1, 1]} : vector<8x92xf32> to vector<8x88xf32>
    %c0_33 = arith.constant 0 : index
    %c0_34 = arith.constant 0 : index
    %66 = vector.load %arg9[%c0_33, %c0_34] : memref<40x88xf32, #tpu.memory_space<vmem>>, vector<8x88xf32>
    tpu.vector_store %arg9[%c0_33, %c0_34], %65 {strides = array<i32>} : memref<40x88xf32, #tpu.memory_space<vmem>>, vector<8x88xf32>,
    %67 = vector.extract_strided_slice %62 {offsets = [0, 1], sizes = [8, 88], strides = [1, 1]} : vector<8x92xf32> to vector<8x88xf32>
    %c8_35 = arith.constant 8 : index
    %c0_36 = arith.constant 0 : index
    %68 = vector.load %arg9[%c8_35, %c0_36] : memref<40x88xf32, #tpu.memory_space<vmem>>, vector<8x88xf32>
    tpu.vector_store %arg9[%c8_35, %c0_36], %67 {strides = array<i32>} : memref<40x88xf32, #tpu.memory_space<vmem>>, vector<8x88xf32>,
    %69 = vector.extract_strided_slice %62 {offsets = [0, 2], sizes = [8, 88], strides = [1, 1]} : vector<8x92xf32> to vector<8x88xf32>
    %c16_37 = arith.constant 16 : index
    %c0_38 = arith.constant 0 : index
    %70 = vector.load %arg9[%c16_37, %c0_38] : memref<40x88xf32, #tpu.memory_space<vmem>>, vector<8x88xf32>
    tpu.vector_store %arg9[%c16_37, %c0_38], %69 {strides = array<i32>} : memref<40x88xf32, #tpu.memory_space<vmem>>, vector<8x88xf32>,
    %71 = vector.extract_strided_slice %62 {offsets = [0, 3], sizes = [8, 88], strides = [1, 1]} : vector<8x92xf32> to vector<8x88xf32>
    %c24 = arith.constant 24 : index
    %c0_39 = arith.constant 0 : index
    %72 = vector.load %arg9[%c24, %c0_39] : memref<40x88xf32, #tpu.memory_space<vmem>>, vector<8x88xf32>
    tpu.vector_store %arg9[%c24, %c0_39], %71 {strides = array<i32>} : memref<40x88xf32, #tpu.memory_space<vmem>>, vector<8x88xf32>,
    %73 = vector.extract_strided_slice %62 {offsets = [0, 4], sizes = [8, 88], strides = [1, 1]} : vector<8x92xf32> to vector<8x88xf32>
    %c32 = arith.constant 32 : index
    %c0_40 = arith.constant 0 : index
    %74 = vector.load %arg9[%c32, %c0_40] : memref<40x88xf32, #tpu.memory_space<vmem>>, vector<8x88xf32>
    tpu.vector_store %arg9[%c32, %c0_40], %73 {strides = array<i32>} : memref<40x88xf32, #tpu.memory_space<vmem>>, vector<8x88xf32>,
    %c0_41 = arith.constant 0 : index
    %c0_42 = arith.constant 0 : index
    %75 = vector.load %arg9[%c0_41, %c0_42] : memref<40x88xf32, #tpu.memory_space<vmem>>, vector<40x88xf32>
    %cst_43 = arith.constant dense<0.000000e+00> : vector<16x88xf32>
    %76 = tpu.matmul %63, %75, %cst_43 {dimension_numbers = #tpu.dot_dimension_numbers<[1], [0], [0], [1], [0, 0, 1, 1], [], []>} : vector<16x40xf32>, vector<40x88xf32>, vector<16x88xf32> -> vector<16x88xf32>
    %77 = vector.broadcast %64 : vector<16x1xf32> to vector<16x88xf32>
    %78 = arith.addf %76, %77 : vector<16x88xf32>
    %79 = tpu.iota {dimensions = array<i32: 0>} : vector<88x44xi32>
    %80 = tpu.iota {dimensions = array<i32: 1>} : vector<88x44xi32>
    %c2_i32_44 = arith.constant 2 : i32
    %81 = vector.broadcast %c2_i32_44 : i32 to vector<88x44xi32>
    %82 = arith.muli %80, %81 : vector<88x44xi32>
    %c0_i32_45 = arith.constant 0 : i32
    %83 = vector.broadcast %c0_i32_45 : i32 to vector<88x44xi32>
    %84 = arith.addi %82, %83 : vector<88x44xi32>
    %85 = arith.cmpi eq, %79, %84 : vector<88x44xi32>
    %86 = arith.extui %85 : vector<88x44xi1> to vector<88x44xi32>
    %87 = arith.sitofp %86 : vector<88x44xi32> to vector<88x44xf32>
    %cst_46 = arith.constant dense<0.000000e+00> : vector<16x44xf32>
    %88 = tpu.matmul %78, %87, %cst_46 {dimension_numbers = #tpu.dot_dimension_numbers<[1], [0], [0], [1], [0, 0, 1, 1], [], []>} : vector<16x88xf32>, vector<88x44xf32>, vector<16x44xf32> -> vector<16x44xf32>
    %c2_i32_47 = arith.constant 2 : i32
    %89 = vector.broadcast %c2_i32_47 : i32 to vector<88x44xi32>
    %90 = arith.muli %80, %89 : vector<88x44xi32>
    %c1_i32_48 = arith.constant 1 : i32
    %91 = vector.broadcast %c1_i32_48 : i32 to vector<88x44xi32>
    %92 = arith.addi %90, %91 : vector<88x44xi32>
    %93 = arith.cmpi eq, %79, %92 : vector<88x44xi32>
    %94 = arith.extui %93 : vector<88x44xi1> to vector<88x44xi32>
    %95 = arith.sitofp %94 : vector<88x44xi32> to vector<88x44xf32>
    %cst_49 = arith.constant dense<0.000000e+00> : vector<16x44xf32>
    %96 = tpu.matmul %78, %95, %cst_49 {dimension_numbers = #tpu.dot_dimension_numbers<[1], [0], [0], [1], [0, 0, 1, 1], [], []>} : vector<16x88xf32>, vector<88x44xf32>, vector<16x44xf32> -> vector<16x44xf32>
    %97 = arith.maximumf %88, %96 : vector<16x44xf32>
    %cst_50 = arith.constant 0.000000e+00 : f32
    %98 = vector.broadcast %cst_50 : f32 to vector<16x44xf32>
    %99 = arith.cmpf oge, %97, %98 : vector<16x44xf32>
    %cst_51 = arith.constant 2.000000e-01 : f32
    %100 = vector.broadcast %cst_51 : f32 to vector<16x44xf32>
    %101 = arith.mulf %100, %97 : vector<16x44xf32>
    %102 = arith.select %99, %97, %101 : vector<16x44xi1>, vector<16x44xf32>
    %c0_52 = arith.constant 0 : index
    %c0_53 = arith.constant 0 : index
    %103 = vector.load %arg5[%c0_52, %c0_53] : memref<16x80xf32, #tpu.memory_space<vmem>>, vector<16x80xf32>
    %c0_54 = arith.constant 0 : index
    %c0_55 = arith.constant 0 : index
    %104 = vector.load %arg6[%c0_54, %c0_55] : memref<16x1xf32, #tpu.memory_space<vmem>>, vector<16x1xf32>
    %105 = vector.extract_strided_slice %102 {offsets = [0, 0], sizes = [16, 40], strides = [1, 1]} : vector<16x44xf32> to vector<16x40xf32>
    %c0_56 = arith.constant 0 : index
    %c0_57 = arith.constant 0 : index
    %106 = vector.load %arg10[%c0_56, %c0_57] : memref<80x40xf32, #tpu.memory_space<vmem>>, vector<16x40xf32>
    tpu.vector_store %arg10[%c0_56, %c0_57], %105 {strides = array<i32>} : memref<80x40xf32, #tpu.memory_space<vmem>>, vector<16x40xf32>,
    %107 = vector.extract_strided_slice %102 {offsets = [0, 1], sizes = [16, 40], strides = [1, 1]} : vector<16x44xf32> to vector<16x40xf32>
    %c16_58 = arith.constant 16 : index
    %c0_59 = arith.constant 0 : index
    %108 = vector.load %arg10[%c16_58, %c0_59] : memref<80x40xf32, #tpu.memory_space<vmem>>, vector<16x40xf32>
    tpu.vector_store %arg10[%c16_58, %c0_59], %107 {strides = array<i32>} : memref<80x40xf32, #tpu.memory_space<vmem>>, vector<16x40xf32>,
    %109 = vector.extract_strided_slice %102 {offsets = [0, 2], sizes = [16, 40], strides = [1, 1]} : vector<16x44xf32> to vector<16x40xf32>
    %c32_60 = arith.constant 32 : index
    %c0_61 = arith.constant 0 : index
    %110 = vector.load %arg10[%c32_60, %c0_61] : memref<80x40xf32, #tpu.memory_space<vmem>>, vector<16x40xf32>
    tpu.vector_store %arg10[%c32_60, %c0_61], %109 {strides = array<i32>} : memref<80x40xf32, #tpu.memory_space<vmem>>, vector<16x40xf32>,
    %111 = vector.extract_strided_slice %102 {offsets = [0, 3], sizes = [16, 40], strides = [1, 1]} : vector<16x44xf32> to vector<16x40xf32>
    %c48 = arith.constant 48 : index
    %c0_62 = arith.constant 0 : index
    %112 = vector.load %arg10[%c48, %c0_62] : memref<80x40xf32, #tpu.memory_space<vmem>>, vector<16x40xf32>
    tpu.vector_store %arg10[%c48, %c0_62], %111 {strides = array<i32>} : memref<80x40xf32, #tpu.memory_space<vmem>>, vector<16x40xf32>,
    %113 = vector.extract_strided_slice %102 {offsets = [0, 4], sizes = [16, 40], strides = [1, 1]} : vector<16x44xf32> to vector<16x40xf32>
    %c64 = arith.constant 64 : index
    %c0_63 = arith.constant 0 : index
    %114 = vector.load %arg10[%c64, %c0_63] : memref<80x40xf32, #tpu.memory_space<vmem>>, vector<16x40xf32>
    tpu.vector_store %arg10[%c64, %c0_63], %113 {strides = array<i32>} : memref<80x40xf32, #tpu.memory_space<vmem>>, vector<16x40xf32>,
    %c0_64 = arith.constant 0 : index
    %c0_65 = arith.constant 0 : index
    %115 = vector.load %arg10[%c0_64, %c0_65] : memref<80x40xf32, #tpu.memory_space<vmem>>, vector<80x40xf32>
    %cst_66 = arith.constant dense<0.000000e+00> : vector<16x40xf32>
    %116 = tpu.matmul %103, %115, %cst_66 {dimension_numbers = #tpu.dot_dimension_numbers<[1], [0], [0], [1], [0, 0, 1, 1], [], []>} : vector<16x80xf32>, vector<80x40xf32>, vector<16x40xf32> -> vector<16x40xf32>
    %117 = vector.broadcast %104 : vector<16x1xf32> to vector<16x40xf32>
    %118 = arith.addf %116, %117 : vector<16x40xf32>
    %119 = tpu.iota {dimensions = array<i32: 0>} : vector<40x20xi32>
    %120 = tpu.iota {dimensions = array<i32: 1>} : vector<40x20xi32>
    %c2_i32_67 = arith.constant 2 : i32
    %121 = vector.broadcast %c2_i32_67 : i32 to vector<40x20xi32>
    %122 = arith.muli %120, %121 : vector<40x20xi32>
    %c0_i32_68 = arith.constant 0 : i32
    %123 = vector.broadcast %c0_i32_68 : i32 to vector<40x20xi32>
    %124 = arith.addi %122, %123 : vector<40x20xi32>
    %125 = arith.cmpi eq, %119, %124 : vector<40x20xi32>
    %126 = arith.extui %125 : vector<40x20xi1> to vector<40x20xi32>
    %127 = arith.sitofp %126 : vector<40x20xi32> to vector<40x20xf32>
    %cst_69 = arith.constant dense<0.000000e+00> : vector<16x20xf32>
    %128 = tpu.matmul %118, %127, %cst_69 {dimension_numbers = #tpu.dot_dimension_numbers<[1], [0], [0], [1], [0, 0, 1, 1], [], []>} : vector<16x40xf32>, vector<40x20xf32>, vector<16x20xf32> -> vector<16x20xf32>
    %c2_i32_70 = arith.constant 2 : i32
    %129 = vector.broadcast %c2_i32_70 : i32 to vector<40x20xi32>
    %130 = arith.muli %120, %129 : vector<40x20xi32>
    %c1_i32_71 = arith.constant 1 : i32
    %131 = vector.broadcast %c1_i32_71 : i32 to vector<40x20xi32>
    %132 = arith.addi %130, %131 : vector<40x20xi32>
    %133 = arith.cmpi eq, %119, %132 : vector<40x20xi32>
    %134 = arith.extui %133 : vector<40x20xi1> to vector<40x20xi32>
    %135 = arith.sitofp %134 : vector<40x20xi32> to vector<40x20xf32>
    %cst_72 = arith.constant dense<0.000000e+00> : vector<16x20xf32>
    %136 = tpu.matmul %118, %135, %cst_72 {dimension_numbers = #tpu.dot_dimension_numbers<[1], [0], [0], [1], [0, 0, 1, 1], [], []>} : vector<16x40xf32>, vector<40x20xf32>, vector<16x20xf32> -> vector<16x20xf32>
    %137 = arith.maximumf %128, %136 : vector<16x20xf32>
    %cst_73 = arith.constant 0.000000e+00 : f32
    %138 = vector.broadcast %cst_73 : f32 to vector<16x20xf32>
    %139 = arith.cmpf oge, %137, %138 : vector<16x20xf32>
    %cst_74 = arith.constant 2.000000e-01 : f32
    %140 = vector.broadcast %cst_74 : f32 to vector<16x20xf32>
    %141 = arith.mulf %140, %137 : vector<16x20xf32>
    %142 = arith.select %139, %137, %141 : vector<16x20xi1>, vector<16x20xf32>
    %c0_75 = arith.constant 0 : index
    %c0_76 = arith.constant 0 : index
    %c0_77 = arith.constant 0 : index
    %143 = vector.load %arg7[%c0_75, %c0_76, %c0_77] : memref<1x16x20xf32, #tpu.memory_space<vmem>>, vector<1x16x20xf32>
    %144 = vector.shape_cast %143 : vector<1x16x20xf32> to vector<16x20xf32>
    %145 = vector.shape_cast %142 : vector<16x20xf32> to vector<1x16x20xf32>
    tpu.vector_store %arg7[%c0_75, %c0_76, %c0_77], %145 {strides = array<i32>} : memref<1x16x20xf32, #tpu.memory_space<vmem>>, vector<1x16x20xf32>,
    return
  }
  func.func @transform_0(%arg0: i32) -> (i32, i32, i32) {
    %c0_i32 = arith.constant 0 : i32
    %c0_i32_0 = arith.constant 0 : i32
    %c0_i32_1 = arith.constant 0 : i32
    return %arg0, %c0_i32, %c0_i32_0 : i32, i32, i32
  }
  func.func @transform_1(%arg0: i32) -> (i32, i32) {
    %c0_i32 = arith.constant 0 : i32
    %c0_i32_0 = arith.constant 0 : i32
    %c0_i32_1 = arith.constant 0 : i32
    return %c0_i32, %c0_i32_0 : i32, i32
  }
  func.func @transform_2(%arg0: i32) -> (i32, i32) {
    %c0_i32 = arith.constant 0 : i32
    %c0_i32_0 = arith.constant 0 : i32
    %c0_i32_1 = arith.constant 0 : i32
    return %c0_i32, %c0_i32_0 : i32, i32
  }
  func.func @transform_3(%arg0: i32) -> (i32, i32) {
    %c0_i32 = arith.constant 0 : i32
    %c0_i32_0 = arith.constant 0 : i32
    %c0_i32_1 = arith.constant 0 : i32
    return %c0_i32, %c0_i32_0 : i32, i32
  }
  func.func @transform_4(%arg0: i32) -> (i32, i32) {
    %c0_i32 = arith.constant 0 : i32
    %c0_i32_0 = arith.constant 0 : i32
    %c0_i32_1 = arith.constant 0 : i32
    return %c0_i32, %c0_i32_0 : i32, i32
  }
  func.func @transform_5(%arg0: i32) -> (i32, i32) {
    %c0_i32 = arith.constant 0 : i32
    %c0_i32_0 = arith.constant 0 : i32
    %c0_i32_1 = arith.constant 0 : i32
    return %c0_i32, %c0_i32_0 : i32, i32
  }
  func.func @transform_6(%arg0: i32) -> (i32, i32, i32) {
    %c0_i32 = arith.constant 0 : i32
    %c0_i32_0 = arith.constant 0 : i32
    %c0_i32_1 = arith.constant 0 : i32
    return %arg0, %c0_i32, %c0_i32_0 : i32, i32, i32
  }
}

</mosaic_0001>

<bundles_post_ra>
// kernel: tpu_custom_call.1
= control target key start
LH: loop header
LB: loop body
LE: loop exit
PB: predicated region body
PF: predicated region fallthrough
CT: control target
= control target key end

     0   :  { %11 = vsyncpa [#allocation6], 0  ;;  %s2176_s0 = inlined_call_operand.hbm [shape: f32[2,1,200], index: 0, kind: input, shape index: {}]   ;;  %s2177_s1 = inlined_call_operand.hbm [shape: f32[8,17], index: 1, kind: input, shape index: {}]   ;;  %s2178_s2 = inlined_call_operand.vmem [shape: f32[16,40], index: 2, kind: input, shape index: {}]   ;;  %s2179_s3 = inlined_call_operand.vmem [shape: f32[16,1], index: 3, kind: input, shape index: {}]   ;;  %s2180_s4 = inlined_call_operand.vmem [shape: f32[16,80], index: 4, kind: input, shape index: {}]   ;;  %s2181_s5 = inlined_call_operand.vmem [shape: f32[16,1], index: 5, kind: input, shape index: {}]   ;;  %s2182_s6 = inlined_call_operand.hbm [shape: f32[2,16,20], index: 6, kind: output, shape index: {}]  }
   0x1   :  { %13 = vsyncpa [#allocation6 + $0x1], 0 }
   0x2   :  { %14 = vsyncpa [#allocation9], 0 }
   0x3   :  { %15 = vsyncpa [#allocation7], 0 }
   0x4   :  { %17 = vsyncpa [#allocation7 + $0x1], 0  ;;  %s1554_s21 = smov 0   ;;  %s1556_s22 = smov 0  }
   0x5   :  { %s1558_s23 = smov 0   ;;  %s1560_s24 = smov 0  }
   0x6 LB: > { %s1575_s25 = sadd.s32 4294967295, %s1496_s24   ;;  %s1128_s26 = sadd.s32 4294967294, %s1496_s24   ;;  %s1496_s24 = sphi %s1560_s24, %s2211_s24   ;;  %s1492_s23 = sphi %s1558_s23, %s2210_s23   ;;  %s1488_s22 = sphi %s1556_s22, %s2209_s22   ;;  %s1484_s21 = sphi %s1554_s21, %s2208_s21  }
   0x7   : > { %p43_p0 = scmp.ne.s32.totalorder %s1488_s22, %s1484_s21  ;;  %p44_p1 = scmp.eq.s32.totalorder %s1575_s25, 0 }
   0x8   : > { %p172_p2 = scmp.eq.s32.totalorder %s1575_s25, 1  ;;  %p178_p3 = scmp.eq.s32.totalorder %s1128_s26, 1 }
   0x9   : > { %p1584_p4 = por %p44_p1, %p43_p0  ;;  %p1129_p5 = scmp.ge.s32.totalorder %s1496_s24, 1 }
   0xa   : > { %p1589_p6 = por %p178_p3, %p43_p0  ;;  %p185_p7 = scmp.lt.s32.totalorder %s1496_s24, 3 }
   0xb   : > { %s197_s7 = sshll.u32 %s2177_s1, 4  ;;  %s1498_s9 = smov [#allocation8]   ;;  %s198_s7 = int_to_ptr.hbm [resolvable:$true] %s197_s7 }
   0xc   : > { %p1597_p8 = pnand %p1129_p5, %p185_p7  ;;  %s199_s10 = sshll.u32 %s1498_s9, 4  ;;  %s200_s10 = int_to_ptr.vmem [resolvable:$true] %s199_s10 }
   0xd   : > { %s1607_s11 = sadd.s32 1, %s1496_s24   ;;  %s30_s12 = sadd.s32 1, %s1492_s23 }
   0xe   : > { %p1294_p10 = pneg %p1597_p8  ;;  %s27_s13 = ssub.s32 %s1496_s24, %s1607_s11 }
   0xf   : > { %p28_p12 = scmp.eq.s32.totalorder %s27_s13, 0  ;;  %p37_p13 = scmp.ne.s32.totalorder %s1492_s23, %s1488_s22 }
  0x10   : > { %p1295_p11 = pnand %p1294_p10, %p44_p1  ;;  %p38_p0 = scmp.eq.s32.totalorder %s1496_s24, 0 }
  0x11   : > { %s1616_s14 = scalar_select %p28_p12, %s1492_s23, %s30_s12  }
  0x12   : > { %1297 = dma.hbm_to_vmem [thread:$0]  (!%p1295_p11), %s198_s7, 128, %s200_s10, [#allocation9]  }
  0x13   : > { %p1620_p3 = por %p172_p2, %p37_p13  ;;  %p1307_p5 = scmp.lt.s32.totalorder %s1496_s24, 2 }
  0x14   : > { %s222_s16 = sand.u32 1, %s1492_s23   ;;  %s1133_s17 = sshll.u32 %s1496_s24, 1 }
  0x15   : > { %p39_p7 = por %p38_p0, %p37_p13  ;;  %s1132_s18 = sshll.u32 %s222_s16, 1 }
  0x16   : > { %s230_s26 = scalar_lea.hbm %s2176_s0, %s1133_s17  ;;  %s226_s30 = scalar_lea.vmem [#allocation5], %s1132_s18 }
  0x17   : > { %s232_s29 = sshll.u32 %s230_s26, 4  ;;  %s234_s7 = sshll.u32 %s226_s30, 4  ;;  %s233_s29 = int_to_ptr.hbm [resolvable:$true] %s232_s29  ;;  %s235_s7 = int_to_ptr.vmem [resolvable:$true] %s234_s7 }
  0x18   : > { %p1630_p10 = pnand %p1307_p5, %p39_p7  ;;  %s223_s10 = scalar_lea.sflag [#allocation6], %s222_s16 }
  0x19   : > { %s1396_s12 = sshra.s32 %s233_s29, 4  ;;  %s1403_s18 = scalar_lea.hbm %s2176_s0, 4  ;;  %s1397_s12 = int_to_ptr.hbm [resolvable:$true] %s1396_s12 }
  0x1a   : > { %s1398_s13 = scalar_lea.hbm %s1397_s12, 2  ;;  %p1400_p11 = pneg %p1630_p10 }
  0x1b   : > { %p1399_p2 = scmp.ne.s32.totalorder %s1397_s12, %s1398_s13  ;;  %p1404_p0 = scmp.lt.s32.totalorder %s1397_s12, %s2176_s0 }
  0x1c   : > { %p1405_p5 = scmp.lt.s32.totalorder %s1403_s18, %s1398_s13 }
  0x1d   : > { %p1401_p12 = pnand %p1400_p11, %p1399_p2 }
  0x1e   : > { %p1406_p7 = por %p1405_p5, %p1404_p0 }
  0x1f   : > { %p1402_p13 = pneg %p1401_p12 }
  0x21   : > { %p1407_p9 = pnand %p1406_p7, %p1402_p13 }
  0x23   : > { %1410 = shalt.err (!%p1407_p9)
}
  0x24   : > { %1301 = dma.hbm_to_vmem [thread:$0]  (!%p1630_p10), %s233_s29, 32, %s235_s7, %s223_s10  }
  0x25   : > { %243 = sbr.rel (%p1597_p8) target bundleno = 1324 (0x52c), region = 44  ;;  %s1647_s16 = sand.u32 (!%p1597_p8), 1, %s1488_s22  }
  0x26   : > { %s1135_s30 = sshll.u32 (!%p1597_p8), %s1647_s16, 1  ;;  %s246_s17 = scalar_lea.sflag (!%p1597_p8), [#allocation6], %s1647_s16 }
  0x27   : > { %s249_s19 = scalar_lea.vmem (!%p1597_p8), [#allocation5], %s1135_s30 }
  0x2a   : > { %1471 = dma.done.wait (%p1584_p4), %s246_s17, 32  }
  0x2b   : > { %1473 = vsyncadd (%p1584_p4), %s246_s17, 4294967264 }
  0x2c   : > { %1475 = dma.done.wait (%p44_p1), [#allocation9], 128  }
  0x2d   : > { %1477 = vsyncadd (%p44_p1), [#allocation9], 4294967168  ;;  %v284_v0 = vld [vmem:[%s249_s19] sm:$0x3]  ;;  %s1499_s8 = smov 119   ;;  %s1500_s29 = smov 112   ;;  %v286_v1 = vlaneseq }
  0x2e   : > { %365 = vrot.lane.b32.xlu1 %v284_v0, %s1499_s8  ;;  %428 = vrot.lane.b32.xlu0 %v284_v0, %s1500_s29  ;;  %s1501_s7 = smov 117   ;;  %s1502_s9 = smov 118   ;;  %vm386_vm1 = vcmask 957440   ;;  %vm395_vm2 = vcmask 949248   ;;  %vm422_vm3 = vcmask 924672   ;;  %vm368_vm4 = vcmask 973824  }
  0x2f   : > { %383 = vrot.lane.b32.xlu2 %v284_v0, %s1501_s7  ;;  %s1503_s10 = smov 120   ;;  %s1504_s27 = smov 116   ;;  %vm1660_vm0 = vcmp.lt.s32.totalorder %v286_v1, 184  ;;  %vm431_vm5 = vcmask 916480   ;;  %vm314_vm6 = vcmask 1022976   ;;  %vm377_vm7 = vcmask 965632  }
  0x30   : > { %290 = vst.msk [vmem:[#allocation2] ss:$8 sm:$0x3] %vm1660_vm0, %v284_v0  ;;  %s1505_s12 = smov 114   ;;  %s1506_s13 = smov 115   ;;  %vm359_vm8 = vcmask 982016  }
  0x31   : > { %s1507_s18 = smov 113   ;;  %s1508_s20 = smov 127   ;;  %vm341_vm9 = vcmask 998400   ;;  %vm447_vm10 = vcmask 1040384   ;;  %vm413_vm11 = vcmask 932864   ;;  %vm404_vm12 = vcmask 941056  }
  0x32   : > { %s1509_s26 = smov 126   ;;  %s1510_s30 = smov 125   ;;  %v1689_v34 = vshrl.u32 %v286_v1, 7  ;;  %v519_v35 = vand.u32 127, %v286_v1  ;;  %vm296_vm14 = vcmask 1039360   ;;  %vm305_vm15 = vcmask 1031168  }
  0x33   : > { %s1511_s17 = smov 124   ;;  %s1512_s19 = smov 123   ;;  %v1515_v45 = vmov 1.0  }
  0x34   : > { %s1513_s8 = smov 122   ;;  %s1514_s29 = smov 121   ;;  %v1694_v40 = vmul.u32 2, %v519_v35  ;;  %v1699_v41 = vadd.s32 120, %v1689_v34  ;;  %v1702_v42 = vadd.s32 112, %v1689_v34  ;;  %v1710_v46 = vadd.s32 104, %v1689_v34 }
  0x35   : > { %v1716_v49 = vadd.s32 96, %v1689_v34  ;;  %v1724_v54 = vadd.s32 88, %v1689_v34  ;;  %v1732_v55 = vadd.s32 80, %v1689_v34  ;;  %v1738_v58 = vadd.s32 72, %v1689_v34  ;;  %v750_v35 = vld [vmem:[%s2179_s3] sm:$0xff]  ;;  %s1446_s7 = scalar_lea.hbm %s2182_s6, 32 }
  0x36   : > { %374 = vrot.lane.b32.xlu1 %v284_v0, %s1502_s9  ;;  %356 = vrot.lane.b32.xlu0 %v284_v0, %s1503_s10  ;;  %vm536_vm13 = vcmp.eq.s32.totalorder %v1699_v41, %v1694_v40  ;;  %v1747_v61 = vadd.s32 64, %v1689_v34  ;;  %v1763_v1 = vadd.s32 1, %v1694_v40  ;;  %v514_v2 = vadd.s32 152, %v1689_v34  ;;  %s1137_s10 = sshll.u32 %s1647_s16, 4 }
  0x37   : > { %392 = vrot.lane.b32.xlu2 %v284_v0, %s1504_s27  ;;  %1165 = vmatpush.msk.msra.mxu2 %vm536_vm13, %v1515_v45  ;;  %s1285_s27 = sshll.u32 %s1575_s25, 4  ;;  %s1030_s25 = scalar_lea.sflag [#allocation7], %s1647_s16 }
  0x3e   : > { %410 = vrot.lane.b32.xlu1 %v284_v0, %s1505_s12  ;;  %401 = vrot.lane.b32.xlu0 %v284_v0, %s1506_s13 }
  0x3f   : > { %419 = vrot.lane.b32.xlu2 %v284_v0, %s1507_s18  ;;  %s1041_s18 = scalar_lea.hbm %s2182_s6, %s1285_s27 }
  0x46   : > { %293 = vrot.lane.b32.xlu0 %v284_v0, %s1508_s20  ;;  %302 = vrot.lane.b32.xlu1 %v284_v0, %s1509_s26 }
  0x47   : > { %311 = vrot.lane.b32.xlu2 %v284_v0, %s1510_s30 }
  0x4e   : > { %320 = vrot.lane.b32.xlu0 %v284_v0, %s1511_s17  ;;  %329 = vrot.lane.b32.xlu1 %v284_v0, %s1512_s19  ;;  %s283_s19 = scalar_lea.vmem [#allocation10], %s1137_s10 }
  0x4f   : > { %338 = vrot.lane.b32.xlu2 %v284_v0, %s1513_s8  ;;  %s1042_s8 = sshll.u32 %s283_s19, 4  ;;  %s1043_s8 = int_to_ptr.vmem [resolvable:$true] %s1042_s8 }
  0x56   : > { %347 = vrot.lane.b32.xlu0 %v284_v0, %s1514_s29  ;;  %v1758_v0 = vadd.s32 56, %v1689_v34  ;;  %s1044_s29 = sshll.u32 %s1041_s18, 4  ;;  %s1045_s29 = int_to_ptr.hbm [resolvable:$true] %s1044_s29 }
  0x89   : > { %v384_v3 = vpop.permute.xlu2 %383 }
  0x8a   : > { %v385_v4 = vrot.slane %v384_v3, 1 }
  0x8c   : > { %v387_v5 = vsel %vm386_vm1, %v384_v3, %v385_v4  ;;  %vm535_vm1 = vcmp.eq.s32.totalorder %v1702_v42, %v1694_v40  ;;  %v1772_v3 = vadd.s32 48, %v1689_v34  ;;  %v517_v4 = vadd.s32 176, %v1689_v34 }
  0x8d   : > { %390 = vst.msk [vmem:[#allocation2 + $0x13] ss:$8 sm:$0x3] %vm1660_vm0, %v387_v5  ;;  %1166 = vmatpush.msk.msra.mxu2 %vm535_vm1, %v1515_v45 }
  0x8e   : > { %vm657_vm13 = vcmp.eq.s32.totalorder %v517_v4, %v1763_v1 }
  0x8f   : > { %1228 = vmatpush.msk.msra.mxu1 %vm657_vm13, %v1515_v45  ;;  %vm543_vm13 = vcmp.eq.s32.totalorder %v517_v4, %v1694_v40 }
  0x91   : > { %v393_v6 = vpop.permute.xlu2 %392 }
  0x92   : > { %v394_v7 = vrot.slane %v393_v6, 1 }
  0x94   : > { %v396_v8 = vsel %vm395_vm2, %v393_v6, %v394_v7  ;;  %vm534_vm2 = vcmp.eq.s32.totalorder %v1710_v46, %v1694_v40  ;;  %v1784_v7 = vadd.s32 40, %v1689_v34 }
  0x95   : > { %399 = vst.msk [vmem:[#allocation2 + $0x14] ss:$8 sm:$0x3] %vm1660_vm0, %v396_v8  ;;  %1167 = vmatpush.msk.msra.mxu2 %vm534_vm2, %v1515_v45  ;;  %v516_v8 = vadd.s32 168, %v1689_v34 }
  0x99   : > { %v420_v9 = vpop.permute.xlu2 %419 }
  0x9a   : > { %v421_v10 = vrot.slane %v420_v9, 1 }
  0x9c   : > { %v423_v11 = vsel %vm422_vm3, %v420_v9, %v421_v10  ;;  %vm533_vm3 = vcmp.eq.s32.totalorder %v1716_v49, %v1694_v40  ;;  %v1792_v9 = vadd.s32 32, %v1689_v34  ;;  %v515_v10 = vadd.s32 160, %v1689_v34 }
  0x9d   : > { %426 = vst.msk [vmem:[#allocation2 + $0x17] ss:$8 sm:$0x3] %vm1660_vm0, %v423_v11  ;;  %1168 = vmatpush.msk.msra.mxu2 %vm533_vm3, %v1515_v45  ;;  %vm654_vm3 = vcmp.eq.s32.totalorder %v514_v2, %v1763_v1 }
  0x9e   : > { %vm525_vm1 = vcmp.eq.s32.totalorder %v1792_v9, %v1694_v40  ;;  %vm655_vm2 = vcmp.eq.s32.totalorder %v515_v10, %v1763_v1 }
  0xa0   : > { %v366_v12 = vpop.permute.xlu1 %365  ;;  %v429_v13 = vpop.permute.xlu0 %428 }
  0xa1   : > { %v367_v14 = vrot.slane %v366_v12, 1  ;;  %v430_v15 = vrot.slane %v429_v13, 1  ;;  %v312_v16 = vpop.permute.xlu2 %311 }
  0xa2   : > { %v313_v17 = vrot.slane %v312_v16, 1 }
  0xa3   : > { %v369_v18 = vsel %vm368_vm4, %v366_v12, %v367_v14  ;;  %v432_v19 = vsel %vm431_vm5, %v429_v13, %v430_v15  ;;  %vm532_vm4 = vcmp.eq.s32.totalorder %v1724_v54, %v1694_v40  ;;  %vm323_vm5 = vcmask 1014784  }
  0xa4   : > { %372 = vst.msk [vmem:[#allocation2 + $0x11] ss:$8 sm:$0x3] %vm1660_vm0, %v369_v18  ;;  %v315_v20 = vsel %vm314_vm6, %v312_v16, %v313_v17  ;;  %vm332_vm6 = vcmask 1006592   ;;  %1169 = vmatpush.msk.msra.mxu2 %vm532_vm4, %v1515_v45  ;;  %v1807_v12 = vadd.s32 24, %v1689_v34  ;;  %v1819_v13 = vadd.s32 16, %v1689_v34 }
  0xa5   : > { %435 = vst.msk [vmem:[#allocation2 + $0x20] ss:$8 sm:$0x3] %vm1660_vm0, %v432_v19  ;;  %v513_v14 = vadd.s32 144, %v1689_v34  ;;  %v1833_v15 = vadd.s32 8, %v1689_v34  ;;  %v512_v16 = vadd.s32 136, %v1689_v34 }
  0xa6   : > { %318 = vst.msk [vmem:[#allocation2 + $0x3] ss:$8 sm:$0x3] %vm1660_vm0, %v315_v20  ;;  %vm523_vm4 = vcmp.eq.s32.totalorder %v1819_v13, %v1694_v40  ;;  %v285_v17 = vld [vmem:[#allocation8] sm:$0xff]  ;;  %v511_v20 = vadd.s32 128, %v1689_v34 }
  0xa8   : > { %v375_v21 = vpop.permute.xlu1 %374  ;;  %v357_v22 = vpop.permute.xlu0 %356 }
  0xa9   : > { %v376_v23 = vrot.slane %v375_v21, 1  ;;  %v358_v24 = vrot.slane %v357_v22, 1  ;;  %v339_v25 = vpop.permute.xlu2 %338 }
  0xaa   : > { %v340_v26 = vrot.slane %v339_v25, 1 }
  0xab   : > { %v378_v27 = vsel %vm377_vm7, %v375_v21, %v376_v23  ;;  %v360_v28 = vsel %vm359_vm8, %v357_v22, %v358_v24  ;;  %vm531_vm7 = vcmp.eq.s32.totalorder %v1732_v55, %v1694_v40  ;;  %vm530_vm8 = vcmp.eq.s32.totalorder %v1738_v58, %v1694_v40 }
  0xac   : > { %381 = vst.msk [vmem:[#allocation2 + $0x12] ss:$8 sm:$0x3] %vm1660_vm0, %v378_v27  ;;  %v441_v29 = vld [vmem:[#allocation2 + $0x20] sm:$0x1]  ;;  %v342_v30 = vsel %vm341_vm9, %v339_v25, %v340_v26  ;;  %1170 = vmatpush.msk.msra.mxu2 %vm531_vm7, %v1515_v45  ;;  %vm529_vm9 = vcmp.eq.s32.totalorder %v1747_v61, %v1694_v40 }
  0xad   : > { %363 = vst.msk [vmem:[#allocation2 + $0x10] ss:$8 sm:$0x3] %vm1660_vm0, %v360_v28  ;;  %1138 = vmatpush.msk.msra.mxu0 %vm447_vm10, %v441_v29  ;;  %v442_v31 = vld [vmem:[#allocation2 + $0x28] sm:$0x1] }
  0xae   : > { %1140 = vmatpush.msk.msra.mxu3 %vm447_vm10, %v442_v31  ;;  %345 = vst.msk [vmem:[#allocation2 + $0x6] ss:$8 sm:$0x3] %vm1660_vm0, %v342_v30  ;;  %1171 = vmatpush.msk.msra.mxu2 %vm530_vm8, %v1515_v45  ;;  %vm528_vm10 = vcmp.eq.s32.totalorder %v1758_v0, %v1694_v40 }
  0xb0   : > { %v411_v32 = vpop.permute.xlu1 %410  ;;  %v402_v33 = vpop.permute.xlu0 %401  ;;  %1172 = vmatpush.msk.msra.mxu2 %vm529_vm9, %v1515_v45 }
  0xb1   : > { %v412_v36 = vrot.slane %v411_v32, 1  ;;  %v403_v37 = vrot.slane %v402_v33, 1 }
  0xb2   : > { %1173 = vmatpush.msk.msra.mxu2 %vm528_vm10, %v1515_v45 }
  0xb3   : > { %v414_v38 = vsel %vm413_vm11, %v411_v32, %v412_v36  ;;  %v405_v39 = vsel %vm404_vm12, %v402_v33, %v403_v37  ;;  %vm350_vm11 = vcmask 990208   ;;  %vm2184_vm12 = vcmp.eq.s32.totalorder %v1772_v3, %v1694_v40  ;;  %v751_v33 = vld [vmem:[%s2179_s3 + $0x8] sm:$0xff] }
  0xb4   : > { %417 = vst.msk [vmem:[#allocation2 + $0x16] ss:$8 sm:$0x3] %vm1660_vm0, %v414_v38  ;;  %1174 = vmatpush.msk.msra.mxu2 %vm2184_vm12, %v1515_v45  ;;  %vm541_vm12 = vcmp.eq.s32.totalorder %v515_v10, %v1694_v40  ;;  %v1516_v36 = vmov 0  }
  0xb5   : > { %408 = vst.msk [vmem:[#allocation2 + $0x15] ss:$8 sm:$0x3] %vm1660_vm0, %v405_v39  ;;  %1364 = vset.pattern.permute.xlu0 %v1516_v36  ;;  %1363 = vset.pattern.permute.xlu2 %v1516_v36 }
  0xb6   : > { %1365 = vset.pattern.permute.xlu1 %v1516_v36 }
  0xb8   : > { %v294_v43 = vpop.permute.xlu0 %293  ;;  %v303_v44 = vpop.permute.xlu1 %302 }
  0xb9   : > { %v295_v47 = vrot.slane %v294_v43, 1  ;;  %v304_v48 = vrot.slane %v303_v44, 1 }
  0xbb   : > { %v297_v50 = vsel %vm296_vm14, %v294_v43, %v295_v47  ;;  %v306_v51 = vsel %vm305_vm15, %v303_v44, %v304_v48  ;;  %vm2183_vm14 = vcmp.eq.s32.totalorder %v1784_v7, %v1694_v40  ;;  %vm656_vm15 = vcmp.eq.s32.totalorder %v516_v8, %v1763_v1  ;;  %v748_v44 = vld [vmem:[%s2178_s2] sm:$0xff]  ;;  %v749_v47 = vld [vmem:[%s2178_s2 + $0x8] sm:$0xff] }
  0xbc   : > { %300 = vst.msk [vmem:[#allocation2 + $0x1] ss:$8 sm:$0x3] %vm1660_vm0, %v297_v50  ;;  %v439_v52 = vld [vmem:[#allocation2 + $0x10] sm:$0xff]  ;;  %v440_v53 = vld [vmem:[#allocation2 + $0x18] sm:$0xff]  ;;  %1175 = vmatpush.msk.msra.mxu2 %vm2183_vm14, %v1515_v45  ;;  %1229 = vmatpush.msk.msra.mxu1 %vm656_vm15, %v1515_v45  ;;  %vm2185_vm15 = vcmp.eq.s32.totalorder %v1833_v15, %v1694_v40  ;;  %vm542_vm14 = vcmp.eq.s32.totalorder %v516_v8, %v1694_v40 }
  0xbd   : > { %468 = vmatpush.msra.mxu0 %v439_v52  ;;  %488 = vmatpush.msra.mxu3 %v440_v53  ;;  %309 = vst.msk [vmem:[#allocation2 + $0x2] ss:$8 sm:$0x3] %vm1660_vm0, %v306_v51 }
  0xbe   : > { %1176 = vmatpush.msk.msra.mxu2 %vm525_vm1, %v1515_v45  ;;  %1230 = vmatpush.msk.msra.mxu1 %vm655_vm2, %v1515_v45  ;;  %vm652_vm2 = vcmp.eq.s32.totalorder %v512_v16, %v1763_v1 }
  0xc0   : > { %v321_v56 = vpop.permute.xlu0 %320  ;;  %v330_v57 = vpop.permute.xlu1 %329  ;;  %1231 = vmatpush.msk.msra.mxu1 %vm654_vm3, %v1515_v45  ;;  %vm649_vm3 = vcmp.eq.s32.totalorder %v1702_v42, %v1763_v1 }
  0xc1   : > { %v322_v59 = vrot.slane %v321_v56, 1  ;;  %v331_v60 = vrot.slane %v330_v57, 1 }
  0xc3   : > { %v324_v62 = vsel %vm323_vm5, %v321_v56, %v322_v59  ;;  %v333_v63 = vsel %vm332_vm6, %v330_v57, %v331_v60  ;;  %vm653_vm5 = vcmp.eq.s32.totalorder %v513_v14, %v1763_v1  ;;  %vm443_vm6 = vcmask 138240  }
  0xc4   : > { %327 = vst.msk [vmem:[#allocation2 + $0x4] ss:$8 sm:$0x3] %vm1660_vm0, %v324_v62  ;;  %1232 = vmatpush.msk.msra.mxu1 %vm653_vm5, %v1515_v45  ;;  %vm648_vm5 = vcmp.eq.s32.totalorder %v1710_v46, %v1763_v1  ;;  %v879_v62 = vld [vmem:[%s2181_s5 + $0x8] sm:$0xff] }
  0xc5   : > { %336 = vst.msk [vmem:[#allocation2 + $0x5] ss:$8 sm:$0x3] %vm1660_vm0, %v333_v63 }
  0xc6   : > { %1233 = vmatpush.msk.msra.mxu1 %vm652_vm2, %v1515_v45  ;;  %vm538_vm2 = vcmp.eq.s32.totalorder %v512_v16, %v1694_v40 }
  0xc8   : > { %v348_v5 = vpop.permute.xlu0 %347 }
  0xc9   : > { %v349_v6 = vrot.slane %v348_v5, 1 }
  0xcb   : > { %v351_v11 = vsel %vm350_vm11, %v348_v5, %v349_v6  ;;  %vm650_vm11 = vcmp.eq.s32.totalorder %v1699_v41, %v1763_v1 }
  0xcc   : > { %354 = vst.msk [vmem:[#allocation2 + $0x7] ss:$8 sm:$0x3] %vm1660_vm0, %v351_v11  ;;  %vm524_vm0 = vcmp.eq.s32.totalorder %v1807_v12, %v1694_v40 }
  0xcd   : > { %1177 = vmatpush.msk.msra.mxu2 %vm524_vm0, %v1515_v45 }
  0xcf   : > { %1178 = vmatpush.msk.msra.mxu2 %vm523_vm4, %v1515_v45 }
  0xd1   : > { %1179 = vmatpush.msk.msra.mxu2 %vm2185_vm15, %v1515_v45  ;;  %vm539_vm15 = vcmp.eq.s32.totalorder %v513_v14, %v1694_v40 }
  0xd3   : > { %v437_v18 = vld [vmem:[#allocation2] sm:$0xff]  ;;  %v438_v19 = vld [vmem:[#allocation2 + $0x8] sm:$0xff] }
  0xd4   : > { %469 = vmatpush.msra.mxu0 %v437_v18  ;;  %489 = vmatpush.msra.mxu3 %v438_v19  ;;  %v877_v19 = vld [vmem:[%s2180_s4 + $0x8] sm:$0xff] }
  0xd5   : > { %1141 = vmatmul.msk.f32.vlgmr.msra.gmra.mxu3 %vm443_vm6, %v285_v17  ;;  %1139 = vmatmul.msk.f32.vlgmr.msra.gmra.mxu0 %vm443_vm6, %v285_v17  ;;  %vm647_vm6 = vcmp.eq.s32.totalorder %v1716_v49, %v1763_v1  ;;  %v876_v17 = vld [vmem:[%s2180_s4] sm:$0xff] }
  0xd6   : > { %1212 = vmatpush.msk.msrb.mxu0 %vm650_vm11, %v1515_v45  ;;  %1181 = vmatpush.msk.msrb.mxu3 %vm543_vm13, %v1515_v45  ;;  %vm540_vm11 = vcmp.eq.s32.totalorder %v514_v2, %v1694_v40  ;;  %vm646_vm13 = vcmp.eq.s32.totalorder %v1724_v54, %v1763_v1 }
  0xd8   : > { %1213 = vmatpush.msk.msrb.mxu0 %vm649_vm3, %v1515_v45  ;;  %1182 = vmatpush.msk.msrb.mxu3 %vm542_vm14, %v1515_v45  ;;  %vm645_vm14 = vcmp.eq.s32.totalorder %v1732_v55, %v1763_v1  ;;  %vm2189_vm3 = vcmp.eq.s32.totalorder %v1747_v61, %v1763_v1 }
  0xda   : > { %1214 = vmatpush.msk.msrb.mxu0 %vm648_vm5, %v1515_v45  ;;  %1183 = vmatpush.msk.msrb.mxu3 %vm541_vm12, %v1515_v45  ;;  %vm2190_vm12 = vcmp.eq.s32.totalorder %v1738_v58, %v1763_v1  ;;  %vm2186_vm5 = vcmp.eq.s32.totalorder %v1772_v3, %v1763_v1 }
  0xdc   : > { %1215 = vmatpush.msk.msrb.mxu0 %vm647_vm6, %v1515_v45  ;;  %1184 = vmatpush.msk.msrb.mxu3 %vm540_vm11, %v1515_v45  ;;  %vm2187_vm6 = vcmp.eq.s32.totalorder %v1784_v7, %v1763_v1  ;;  %vm639_vm11 = vcmp.eq.s32.totalorder %v1792_v9, %v1763_v1  ;;  %v878_v9 = vld [vmem:[%s2181_s5] sm:$0xff] }
  0xde   : > { %1216 = vmatpush.msk.msrb.mxu0 %vm646_vm13, %v1515_v45  ;;  %1185 = vmatpush.msk.msrb.mxu3 %vm539_vm15, %v1515_v45  ;;  %vm2188_vm15 = vcmp.eq.s32.totalorder %v1758_v0, %v1763_v1  ;;  %vm638_vm13 = vcmp.eq.s32.totalorder %v1807_v12, %v1763_v1 }
  0xe0   : > { %1217 = vmatpush.msk.msrb.mxu0 %vm645_vm14, %v1515_v45  ;;  %1186 = vmatpush.msk.msrb.mxu3 %vm538_vm2, %v1515_v45  ;;  %vm637_vm2 = vcmp.eq.s32.totalorder %v1819_v13, %v1763_v1 }
  0xe2   : > { %1218 = vmatpush.msk.msrb.mxu0 %vm2190_vm12, %v1515_v45  ;;  %vm651_vm12 = vcmp.eq.s32.totalorder %v511_v20, %v1763_v1 }
  0xe3   : > { %1234 = vmatpush.msk.msra.mxu1 %vm651_vm12, %v1515_v45  ;;  %vm786_vm12 = vcmask 326656  }
  0xe4   : > { %1219 = vmatpush.msk.msrb.mxu0 %vm2189_vm3, %v1515_v45  ;;  %vm537_vm3 = vcmp.eq.s32.totalorder %v511_v20, %v1694_v40 }
  0xe5   : > { %1187 = vmatpush.msk.msrb.mxu3 %vm537_vm3, %v1515_v45  ;;  %1238 = vmatpush.msk.msrb.mxu1 %vm531_vm7, %v1515_v45  ;;  %vm2198_vm7 = vcmp.eq.s32.totalorder %v1833_v15, %v1694_v40  ;;  %vm2202_vm3 = vcmp.eq.s32.totalorder %v1738_v58, %v1763_v1 }
  0xe6   : > { %1220 = vmatpush.msk.msrb.mxu0 %vm2188_vm15, %v1515_v45  ;;  %vm635_vm15 = vcmp.eq.s32.totalorder %v1689_v34, %v1763_v1 }
  0xe7   : > { %1239 = vmatpush.msk.msrb.mxu1 %vm530_vm8, %v1515_v45  ;;  %vm2199_vm8 = vcmp.eq.s32.totalorder %v1772_v3, %v1694_v40 }
  0xe8   : > { %1221 = vmatpush.msk.msrb.mxu0 %vm2186_vm5, %v1515_v45  ;;  %vm636_vm5 = vcmp.eq.s32.totalorder %v1833_v15, %v1763_v1 }
  0xe9   : > { %1240 = vmatpush.msk.msrb.mxu1 %vm529_vm9, %v1515_v45  ;;  %vm2200_vm9 = vcmp.eq.s32.totalorder %v1784_v7, %v1694_v40 }
  0xea   : > { %1222 = vmatpush.msk.msrb.mxu0 %vm2187_vm6, %v1515_v45  ;;  %vm521_vm6 = vcmp.eq.s32.totalorder %v1689_v34, %v1694_v40 }
  0xeb   : > { %1180 = vmatpush.msk.msra.mxu2 %vm521_vm6, %v1515_v45  ;;  %1241 = vmatpush.msk.msrb.mxu1 %vm528_vm10, %v1515_v45  ;;  %vm2201_vm10 = vmmov %vm2198_vm7 }
  0xec   : > { %1223 = vmatpush.msk.msrb.mxu0 %vm639_vm11, %v1515_v45 }
  0xed   : > { %1242 = vmatpush.msk.msrb.mxu1 %vm2199_vm8, %v1515_v45  ;;  %vm2206_vm8 = vcmp.eq.s32.totalorder %v1784_v7, %v1763_v1 }
  0xee   : > { %1224 = vmatpush.msk.msrb.mxu0 %vm638_vm13, %v1515_v45 }
  0xef   : > { %1243 = vmatpush.msk.msrb.mxu1 %vm2200_vm9, %v1515_v45 }
  0xf0   : > { %1225 = vmatpush.msk.msrb.mxu0 %vm637_vm2, %v1515_v45 }
  0xf1   : > { %1244 = vmatpush.msk.msrb.mxu1 %vm525_vm1, %v1515_v45 }
  0xf2   : > { %1226 = vmatpush.msk.msrb.mxu0 %vm636_vm5, %v1515_v45 }
  0xf3   : > { %1245 = vmatpush.msk.msrb.mxu1 %vm524_vm0, %v1515_v45 }
  0xf4   : > { %1227 = vmatpush.msk.msrb.mxu0 %vm635_vm15, %v1515_v45 }
  0xf5   : > { %1246 = vmatpush.msk.msrb.mxu1 %vm523_vm4, %v1515_v45 }
  0xf6   : > { %1266 = vmatpush.msk.msra.mxu0 %vm525_vm1, %v1515_v45  ;;  %vm590_vm1 = vcmask 457728  }
  0xf7   : > { %1247 = vmatpush.msk.msrb.mxu1 %vm2201_vm10, %v1515_v45 }
  0xf8   : > { %1267 = vmatpush.msk.msra.mxu0 %vm524_vm0, %v1515_v45 }
  0xf9   : > { %1248 = vmatpush.msk.msrb.mxu1 %vm521_vm6, %v1515_v45 }
  0xfa   : > { %1268 = vmatpush.msk.msra.mxu0 %vm523_vm4, %v1515_v45  ;;  %vm752_vm4 = vcmask 719872  }
  0xfc   : > { %1269 = vmatpush.msk.msra.mxu0 %vm2198_vm7, %v1515_v45  ;;  %vm2204_vm7 = vcmp.eq.s32.totalorder %v1758_v0, %v1763_v1 }
  0xfe   : > { %1270 = vmatpush.msk.msra.mxu0 %vm521_vm6, %v1515_v45  ;;  %vm2203_vm6 = vcmp.eq.s32.totalorder %v1747_v61, %v1763_v1 }
 0x152   : > { %v471_v21 = vpop.f32.mrf.mxu0 }
 0x153   : > { %610 = vmatmul.f32.vlgmr.msra.gmra.mxu2 %v471_v21  ;;  %720 = vmatmul.f32.vlgmr.msrb.gmra.mxu0 %v471_v21 }
 0x158   : > { %v491_v22 = vpop.f32.mrf.mxu3 }
 0x159   : > { %1188 = vmatmul.msk.f32.vlgmr.msrb.gmra.mxu3 %vm590_vm1, %v491_v22  ;;  %1235 = vmatmul.msk.f32.vlgmr.msra.gmra.mxu1 %vm590_vm1, %v491_v22 }
 0x15a   : > { %1273 = vmatpush.msk.msra.mxu1 %vm639_vm11, %v1515_v45 }
 0x15c   : > { %1274 = vmatpush.msk.msra.mxu1 %vm638_vm13, %v1515_v45 }
 0x15e   : > { %1275 = vmatpush.msk.msra.mxu1 %vm637_vm2, %v1515_v45 }
 0x160   : > { %1276 = vmatpush.msk.msra.mxu1 %vm636_vm5, %v1515_v45 }
 0x162   : > { %1277 = vmatpush.msk.msra.mxu1 %vm635_vm15, %v1515_v45 }
 0x1d0   : > { %v721_v23 = vpop.f32.mrf.mxu0 }
 0x1d6   : > { %v741_v24 = vpop.f32.mrf.mxu1  ;;  %v611_v25 = vpop.f32.mrf.mxu2 }
 0x1d7   : > { %v742_v27 = vadd.f32 %v741_v24, %v721_v23 }
 0x1dc   : > { %v631_v26 = vpop.f32.mrf.mxu3 }
 0x1dd   : > { %v632_v28 = vadd.f32 %v631_v26, %v611_v25 }
 0x1df   : > { %v744_v29 = vmax.f32 %v632_v28, %v742_v27 }
 0x1e1   : > { %vm745_vm0 = vcmp.ge.f32.partialorder %v744_v29, 0.0  ;;  %v746_v30 = vmul.f32 0.2, %v744_v29 }
 0x1e3   : > { %v747_v31 = vsel %vm745_vm0, %v744_v29, %v746_v30 }
 0x1e4   : > { %759 = vrot.lane.b32.xlu0 %v747_v31, %s1509_s26  ;;  %753 = vst.msk [vmem:[#allocation3] sm:$0xff] %vm752_vm4, %v747_v31  ;;  %763 = vrot.lane.b32.xlu2 %v747_v31, %s1510_s30 }
 0x1e5   : > { %767 = vrot.lane.b32.xlu1 %v747_v31, %s1511_s17 }
 0x1eb   : > { %v771_v46 = vld [vmem:[#allocation3] sm:$0xff] }
 0x1ec   : > { %783 = vperm.xlu0 %1364, %v751_v33   ;;  %778 = vperm.xlu2 %1363, %v750_v35  }
 0x1ed   : > { %755 = vrot.lane.b32.xlu1 %v747_v31, %s1508_s20 }
 0x23e   : > { %v764_v32 = vpop.permute.xlu2 %763 }
 0x23f   : > { %766 = vst.msk [vmem:[#allocation3 + $0x18] sm:$0xff] %vm752_vm4, %v764_v32 }
 0x246   : > { %v774_v41 = vld [vmem:[#allocation3 + $0x18] sm:$0xff]  ;;  %v779_v48 = vpop.permute.xlu2 %778 }
 0x256   : > { %v760_v37 = vpop.permute.xlu0 %759 }
 0x257   : > { %762 = vst.msk [vmem:[#allocation3 + $0x10] sm:$0xff] %vm752_vm4, %v760_v37  ;;  %v768_v38 = vpop.permute.xlu1 %767 }
 0x258   : > { %770 = vst.msk [vmem:[#allocation3 + $0x20] sm:$0xff] %vm752_vm4, %v768_v38 }
 0x25e   : > { %v773_v42 = vld [vmem:[#allocation3 + $0x10] sm:$0xff]  ;;  %v784_v51 = vpop.permute.xlu0 %783 }
 0x25f   : > { %v756_v39 = vpop.permute.xlu1 %755  ;;  %v775_v40 = vld [vmem:[#allocation3 + $0x20] sm:$0xff] }
 0x260   : > { %758 = vst.msk [vmem:[#allocation3 + $0x8] sm:$0xff] %vm752_vm4, %v756_v39  ;;  %804 = vmatpush.msra.mxu3 %v775_v40 }
 0x262   : > { %805 = vmatpush.msra.mxu3 %v774_v41 }
 0x264   : > { %806 = vmatpush.msra.mxu3 %v773_v42 }
 0x267   : > { %v772_v43 = vld [vmem:[#allocation3 + $0x8] sm:$0xff] }
 0x268   : > { %807 = vmatpush.msra.mxu3 %v772_v43 }
 0x26a   : > { %808 = vmatpush.msra.mxu3 %v771_v46 }
 0x26b   : > { %1236 = vmatmul.msk.f32.vlgmr.msra.gmra.mxu3 %vm786_vm12, %v748_v44 }
 0x26c   : > { %1251 = vmatpush.msk.msrb.mxu3 %vm645_vm14, %v1515_v45  ;;  %vm2205_vm14 = vcmp.eq.s32.totalorder %v1772_v3, %v1763_v1 }
 0x26e   : > { %1252 = vmatpush.msk.msrb.mxu3 %vm2202_vm3, %v1515_v45 }
 0x270   : > { %1253 = vmatpush.msk.msrb.mxu3 %vm2203_vm6, %v1515_v45 }
 0x272   : > { %1254 = vmatpush.msk.msrb.mxu3 %vm2204_vm7, %v1515_v45 }
 0x273   : > { %1237 = vmatmul.msk.f32.gmra.mxu3 %vm786_vm12, %v749_v47 }
 0x274   : > { %1255 = vmatpush.msk.msrb.mxu3 %vm2205_vm14, %v1515_v45 }
 0x276   : > { %1256 = vmatpush.msk.msrb.mxu3 %vm2206_vm8, %v1515_v45 }
 0x278   : > { %1257 = vmatpush.msk.msrb.mxu3 %vm639_vm11, %v1515_v45  ;;  %vm936_vm11 = vcmask 654336  }
 0x27a   : > { %1258 = vmatpush.msk.msrb.mxu3 %vm638_vm13, %v1515_v45 }
 0x27c   : > { %1259 = vmatpush.msk.msrb.mxu3 %vm637_vm2, %v1515_v45  ;;  %vm1026_vm2 = vcmask 162816  }
 0x27e   : > { %1260 = vmatpush.msk.msrb.mxu3 %vm636_vm5, %v1515_v45 }
 0x280   : > { %1261 = vmatpush.msk.msrb.mxu3 %vm635_vm15, %v1515_v45 }
 0x2ee   : > { %v810_v49 = vpop.f32.mrf.mxu3 }
 0x2ef   : > { %v811_v50 = vadd.f32 %v810_v49, %v779_v48 }
 0x2f1   : > { %1249 = vmatmul.msk.f32.vlgmr.msrb.gmra.mxu1 %vm752_vm4, %v811_v50  ;;  %1262 = vmatmul.msk.f32.vlgmr.msrb.gmra.mxu3 %vm752_vm4, %v811_v50 }
 0x2f6   : > { %v813_v52 = vpop.f32.mrf.mxu3 }
 0x2f7   : > { %v814_v53 = vadd.f32 %v813_v52, %v784_v51 }
 0x2f9   : > { %1250 = vmatmul.msk.f32.gmra.mxu1 %vm752_vm4, %v814_v53  ;;  %1263 = vmatmul.msk.f32.gmra.mxu3 %vm752_vm4, %v814_v53 }
 0x36e   : > { %v839_v54 = vpop.f32.mrf.mxu1 }
 0x374   : > { %v862_v55 = vpop.f32.mrf.mxu3 }
 0x375   : > { %v868_v56 = vmax.f32 %v839_v54, %v862_v55 }
 0x376   : > { %v842_v57 = vpop.f32.mrf.mxu1 }
 0x377   : > { %vm870_vm5 = vcmp.ge.f32.partialorder %v868_v56, 0.0  ;;  %v872_v34 = vmul.f32 0.2, %v868_v56 }
 0x379   : > { %v874_v45 = vsel %vm870_vm5, %v868_v56, %v872_v34 }
 0x37a   : > { %880 = vst.msk [vmem:[#allocation4] sm:$0xff] %vm786_vm12, %v874_v45  ;;  %908 = vrot.lane.b32.xlu2 %v874_v45, %s1511_s17 }
 0x37c   : > { %v865_v58 = vpop.f32.mrf.mxu3 }
 0x37d   : > { %v869_v59 = vmax.f32 %v842_v57, %v865_v58 }
 0x37f   : > { %vm871_vm15 = vcmp.ge.f32.partialorder %v869_v59, 0.0  ;;  %v873_v60 = vmul.f32 0.2, %v869_v59 }
 0x381   : > { %v875_v61 = vsel %vm871_vm15, %v869_v59, %v873_v60  ;;  %v916_v18 = vld [vmem:[#allocation4] sm:$0xff] }
 0x382   : > { %881 = vst.msk [vmem:[#allocation4 + $0x8] sm:$0xff] %vm786_vm12, %v875_v61  ;;  %900 = vrot.lane.b32.xlu2 %v874_v45, %s1510_s30  ;;  %894 = vrot.lane.b32.xlu0 %v875_v61, %s1509_s26 }
 0x383   : > { %910 = vrot.lane.b32.xlu1 %v875_v61, %s1511_s17 }
 0x389   : > { %v917_v16 = vld [vmem:[#allocation4 + $0x8] sm:$0xff] }
 0x38a   : > { %886 = vrot.lane.b32.xlu2 %v875_v61, %s1508_s20  ;;  %884 = vrot.lane.b32.xlu0 %v874_v45, %s1508_s20  ;;  %s1440_s20 = sshra.s32 %s1045_s29, 4  ;;  %s1441_s20 = int_to_ptr.hbm [resolvable:$true] %s1440_s20 }
 0x38b   : > { %902 = vrot.lane.b32.xlu1 %v875_v61, %s1510_s30  ;;  %p1447_p9 = scmp.lt.s32.totalorder %s1441_s20, %s2182_s6 }
 0x392   : > { %933 = vperm.xlu2 %1363, %v879_v62  }
 0x393   : > { %892 = vrot.lane.b32.xlu1 %v874_v45, %s1509_s26  ;;  %s1442_s26 = scalar_lea.hbm %s1441_s20, 16 }
 0x394   : > { %p1443_p1 = scmp.ne.s32.totalorder %s1441_s20, %s1442_s26  ;;  %p1448_p10 = scmp.lt.s32.totalorder %s1446_s7, %s1442_s26 }
 0x396   : > { %p1444_p4 = pnand %p1443_p1, %p1620_p3  ;;  %p1449_p2 = por %p1448_p10, %p1447_p9 }
 0x398   : > { %p1445_p8 = pneg %p1444_p4 }
 0x39a   : > { %p1450_p11 = pnand %p1449_p2, %p1445_p8 }
 0x39b   : > { %928 = vperm.xlu1 %1365, %v878_v9  }
 0x3d4   : > { %v909_v63 = vpop.permute.xlu2 %908 }
 0x3d5   : > { %914 = vst.msk [vmem:[#allocation4 + $0x40] sm:$0xff] %vm786_vm12, %v909_v63 }
 0x3dc   : > { %v901_v0 = vpop.permute.xlu2 %900  ;;  %v924_v8 = vld [vmem:[#allocation4 + $0x40] sm:$0xff] }
 0x3dd   : > { %906 = vst.msk [vmem:[#allocation4 + $0x30] sm:$0xff] %vm786_vm12, %v901_v0 }
 0x3e4   : > { %v887_v1 = vpop.permute.xlu2 %886  ;;  %v922_v12 = vld [vmem:[#allocation4 + $0x30] sm:$0xff] }
 0x3e5   : > { %891 = vst.msk [vmem:[#allocation4 + $0x18] sm:$0xff] %vm786_vm12, %v887_v1 }
 0x3ec   : > { %v919_v14 = vld [vmem:[#allocation4 + $0x18] sm:$0xff]  ;;  %v934_v23 = vpop.permute.xlu2 %933 }
 0x3f4   : > { %v895_v3 = vpop.permute.xlu0 %894 }
 0x3f5   : > { %899 = vst.msk [vmem:[#allocation4 + $0x28] sm:$0xff] %vm786_vm12, %v895_v3  ;;  %v911_v4 = vpop.permute.xlu1 %910 }
 0x3f6   : > { %915 = vst.msk [vmem:[#allocation4 + $0x48] sm:$0xff] %vm786_vm12, %v911_v4 }
 0x3fc   : > { %v885_v5 = vpop.permute.xlu0 %884  ;;  %v921_v2 = vld [vmem:[#allocation4 + $0x28] sm:$0xff] }
 0x3fd   : > { %890 = vst.msk [vmem:[#allocation4 + $0x10] sm:$0xff] %vm786_vm12, %v885_v5  ;;  %v903_v6 = vpop.permute.xlu1 %902  ;;  %v925_v7 = vld [vmem:[#allocation4 + $0x48] sm:$0xff] }
 0x3fe   : > { %907 = vst.msk [vmem:[#allocation4 + $0x38] sm:$0xff] %vm786_vm12, %v903_v6  ;;  %949 = vmatpush.msrb.mxu2 %v925_v7 }
 0x400   : > { %950 = vmatpush.msrb.mxu2 %v924_v8 }
 0x404   : > { %v918_v15 = vld [vmem:[#allocation4 + $0x10] sm:$0xff] }
 0x405   : > { %v893_v10 = vpop.permute.xlu1 %892  ;;  %v923_v11 = vld [vmem:[#allocation4 + $0x38] sm:$0xff] }
 0x406   : > { %898 = vst.msk [vmem:[#allocation4 + $0x20] sm:$0xff] %vm786_vm12, %v893_v10  ;;  %951 = vmatpush.msrb.mxu2 %v923_v11 }
 0x408   : > { %952 = vmatpush.msrb.mxu2 %v922_v12 }
 0x40a   : > { %953 = vmatpush.msrb.mxu2 %v921_v2 }
 0x40d   : > { %v920_v13 = vld [vmem:[#allocation4 + $0x20] sm:$0xff]  ;;  %v929_v20 = vpop.permute.xlu1 %928 }
 0x40e   : > { %954 = vmatpush.msrb.mxu2 %v920_v13 }
 0x410   : > { %955 = vmatpush.msrb.mxu2 %v919_v14 }
 0x412   : > { %956 = vmatpush.msrb.mxu2 %v918_v15 }
 0x414   : > { %957 = vmatpush.msrb.mxu2 %v917_v16 }
 0x416   : > { %958 = vmatpush.msrb.mxu2 %v916_v18 }
 0x417   : > { %1264 = vmatmul.msk.f32.vlgmr.msrb.gmra.mxu2 %vm936_vm11, %v876_v17 }
 0x41f   : > { %1265 = vmatmul.msk.f32.gmra.mxu2 %vm936_vm11, %v877_v19 }
 0x49a   : > { %v960_v21 = vpop.f32.mrf.mxu2 }
 0x49b   : > { %v961_v22 = vadd.f32 %v960_v21, %v929_v20 }
 0x49d   : > { %1271 = vmatmul.msk.f32.vlgmr.msra.gmra.mxu0 %vm786_vm12, %v961_v22  ;;  %1278 = vmatmul.msk.f32.vlgmr.msra.gmra.mxu1 %vm786_vm12, %v961_v22 }
 0x4a2   : > { %v963_v24 = vpop.f32.mrf.mxu2 }
 0x4a3   : > { %v964_v25 = vadd.f32 %v963_v24, %v934_v23 }
 0x4a5   : > { %1272 = vmatmul.msk.f32.gmra.mxu0 %vm786_vm12, %v964_v25  ;;  %1279 = vmatmul.msk.f32.gmra.mxu1 %vm786_vm12, %v964_v25 }
 0x51a   : > { %v989_v26 = vpop.f32.mrf.mxu0  ;;  %v1012_v27 = vpop.f32.mrf.mxu1 }
 0x51b   : > { %v1018_v28 = vmax.f32 %v989_v26, %v1012_v27 }
 0x51d   : > { %vm1020_vm13 = vcmp.ge.f32.partialorder %v1018_v28, 0.0  ;;  %v1022_v29 = vmul.f32 0.2, %v1018_v28 }
 0x51f   : > { %v1024_v30 = vsel %vm1020_vm13, %v1018_v28, %v1022_v29 }
 0x520   : > { %1027 = vst.msk [vmem:[%s283_s19] sm:$0xff] %vm1026_vm2, %v1024_v30 }
 0x522   : > { %v992_v31 = vpop.f32.mrf.mxu0  ;;  %v1015_v32 = vpop.f32.mrf.mxu1 }
 0x523   : > { %v1019_v33 = vmax.f32 %v992_v31, %v1015_v32 }
 0x525   : > { %vm1021_vm9 = vcmp.ge.f32.partialorder %v1019_v33, 0.0  ;;  %v1023_v35 = vmul.f32 0.2, %v1019_v33 }
 0x527   : > { %v1025_v36 = vsel %vm1021_vm9, %v1019_v33, %v1023_v35 }
 0x528   : > { %1028 = vst.msk [vmem:[%s283_s19 + $0x8] sm:$0xff] %vm1026_vm2, %v1025_v36 }
 0x529   : > { %1453 = shalt.err (!%p1450_p11)
}
 0x52a   : > { %s1517_s16 = smov 128   ;;  %s1518_s27 = smov 8  }
 0x52b   : > { %1292 = dma.vmem_to_hbm [thread:$0]  (%p1620_p3), %s1043_s8, 256, %s1045_s29, %s1030_s25, %s1517_s16, %s1517_s16, %s1518_s27  }
 0x52c PF: > { %s1059_s12 = sand.u32 1, %s1484_s21   ;;  %p2207_p12 = scmp.ge.s32.totalorder %s1496_s24, 2 }
 0x52d   : > { %s1060_s13 = scalar_lea.sflag [#allocation7], %s1059_s12 }
 0x52e   : > { %p1303_p13 = pnand %p2207_p12, %p1589_p6 }
 0x530   : > { %p1304_p0 = pneg %p1303_p13 }
 0x532   : > { %1479 = dma.done.wait (%p1304_p0), %s1060_s13, 256  }
 0x533   : > { %1481 = vsyncadd (%p1304_p0), %s1060_s13, 4294967040  ;;  %p20_p5 = scmp.ge.s32.totalorder %s1607_s11, 4   ;;  %s2208_s21 = smov %s1488_s22 }
 0x534   : > { %s2209_s22 = smov %s1492_s23  ;;  %s2210_s23 = smov %s1616_s14 }
 0x535   : > { %s2211_s24 = smov %s1607_s11  ;;  %22 = sbr.rel (!%p20_p5) target bundleno = 6 (0x6), region = 109 }
 0x53a   :  { %1066 = vsyncpa [#allocation6], 1 }
 0x53b   :  { %1068 = vsyncpa [#allocation6 + $0x1], 1 }
 0x53c   :  { %1069 = vsyncpa [#allocation9], 1 }
 0x53d   :  { %1070 = vsyncpa [#allocation7], 1 }
 0x53e   :  { %1072 = vsyncpa [#allocation7 + $0x1], 1 }

</bundles_post_ra>
